<compile_context>
chip_gen: v6e
topology: v6e:2x2x1
jax: 0.10.0
libtpu: 0.0.40
codegen_flags: <defaults>
</compile_context>

<pallas_src>
import functools

import jax
import jax.numpy as jnp
from jax.experimental import pallas as pl
from jax.experimental.pallas import tpu as pltpu

LANES = 128


def _linear_relu_kernel(w_ref, b_ref, x_ref, o_ref, *, fout):
    # w_ref, b_ref: SMEM f32[fout]               (scalar-prefetched parameters)
    # x_ref:        VMEM f32[block_rows, 128]    (lane-dense batch tile)
    # o_ref:        VMEM f32[fout, block_rows, 128]
    xb = x_ref[...]
    for j in range(fout):   # fout == 3: static unroll, pure VPU (mul+add+max)
        o_ref[j, :, :] = jnp.maximum(xb * w_ref[j] + b_ref[j], 0.0)


def _choose_block_rows(n_rows, block_rows_max):
    # Prefer >= 2 grid steps once there is enough work (so v7x's two
    # TensorCores both get a share of the "parallel" axis); keep block_rows a
    # multiple of 8 (f32 sublane tile) and capped at block_rows_max.
    target = max(8, pl.cdiv(n_rows, 2))
    target = pl.cdiv(target, 8) * 8
    return min(block_rows_max, target)


@functools.partial(jax.jit, static_argnames=("block_rows_max",))
def net_forward(x, w, b, *, block_rows_max=1024):
    """ReLU(x @ w.T + b) for x:[N,1], w:[Fout,1] (PyTorch layout), b:[Fout]."""
    N, fin = x.shape
    assert fin == 1, "Net.fc is Linear(1, 3)"
    fout = b.shape[0]

    n_rows = pl.cdiv(N, LANES)
    block_rows = _choose_block_rows(n_rows, block_rows_max)
    g = pl.cdiv(n_rows, block_rows)
    rows = g * block_rows
    n_pad = rows * LANES

    # Lane-dense repack (in_features == 1, so x is just N scalars).  Under jit
    # the pad/reshape fuse with upstream producers instead of materializing an
    # extra padded copy of x.
    x_lane = jnp.pad(x.reshape(N), (0, n_pad - N)).reshape(rows, LANES)

    w_flat = w.reshape(fout).astype(jnp.float32)
    b_flat = b.reshape(fout).astype(jnp.float32)

    kernel = functools.partial(_linear_relu_kernel, fout=fout)

    cost = pl.CostEstimate(
        flops=3 * fout * n_pad,                 # mul + add + max per channel
        transcendentals=0,
        bytes_accessed=4 * n_pad * (1 + fout),  # read x once, write fout chans
    )

    out_lane = pl.pallas_call(
        kernel,
        out_shape=jax.ShapeDtypeStruct((fout, rows, LANES), jnp.float32),
        grid_spec=pltpu.PrefetchScalarGridSpec(
            num_scalar_prefetch=2,              # w, b -> SMEM
            grid=(g,),                          # batch tiling -> pipelined DMA
            in_specs=[
                pl.BlockSpec((block_rows, LANES), lambda i, w_s, b_s: (i, 0)),
            ],
            out_specs=pl.BlockSpec(
                (fout, block_rows, LANES), lambda i, w_s, b_s: (0, i, 0)),
        ),
        compiler_params=pltpu.CompilerParams(
            dimension_semantics=("parallel",)),  # megacore sharding on v7x
        cost_estimate=cost,
    )(w_flat, b_flat, x_lane)

    # Slice away the padded tail BEFORE transposing so the layout fix only
    # touches the live 3*N elements.  [Fout, n_pad] -> [Fout, N] -> [N, Fout].
    return out_lane.reshape(fout, n_pad)[:, :N].T


if __name__ == "__main__":
    key = jax.random.PRNGKey(0)
    kx, kw, kb = jax.random.split(key, 3)

    # Small batch consistent with the module: x is [N, 1] for Linear(1, 3).
    N, Fin, Fout = 16, 1, 3
    x = jax.random.normal(kx, (N, Fin), dtype=jnp.float32)

    # nn.Linear default init: uniform(-1/sqrt(in), 1/sqrt(in)), weight [out,in].
    bound = 1.0 / jnp.sqrt(jnp.float32(Fin))
    w = jax.random.uniform(kw, (Fout, Fin), minval=-bound, maxval=bound,
                           dtype=jnp.float32)
    b = jax.random.uniform(kb, (Fout,), minval=-bound, maxval=bound,
                           dtype=jnp.float32)

    out = net_forward(x, w, b)
    jax.block_until_ready(out)

    # Reference check in plain JAX.
    ref = jnp.maximum(x @ w.T + b, 0.0)
    assert out.shape == ref.shape
    assert jnp.allclose(out, ref, atol=1e-5), "mismatch vs reference"

    print("KERNEL_OK")
</pallas_src>

<mosaic_0001>
module attributes {stable_mosaic.version = 11 : i64} {
  func.func @_linear_relu_kernel(%arg0: i32, %arg1: memref<3xf32, #tpu.memory_space<smem>>, %arg2: memref<3xf32, #tpu.memory_space<smem>>, %arg3: memref<8x128xf32, #tpu.memory_space<vmem>>, %arg4: memref<3x8x128xf32, #tpu.memory_space<vmem>>) attributes {dimension_semantics = [#tpu.dimension_semantics<parallel>], iteration_bounds = array<i64: 1>, scalar_prefetch = 2 : i64, scratch_operands = 0 : i64, tpu.core_type = #tpu.core_type<tc>, window_params = [{transform_indices = @transform_0, window_bounds = array<i64: 8, 128>}, {transform_indices = @transform_1, window_bounds = array<i64: 3, 8, 128>}]} {
    %c0 = arith.constant 0 : index
    %c0_0 = arith.constant 0 : index
    %0 = vector.load %arg3[%c0, %c0_0] : memref<8x128xf32, #tpu.memory_space<vmem>>, vector<8x128xf32>
    %c0_1 = arith.constant 0 : index
    %1 = memref.load %arg1[%c0_1] : memref<3xf32, #tpu.memory_space<smem>>
    %2 = vector.broadcast %1 : f32 to vector<8x128xf32>
    %3 = arith.mulf %0, %2 : vector<8x128xf32>
    %c0_2 = arith.constant 0 : index
    %4 = memref.load %arg2[%c0_2] : memref<3xf32, #tpu.memory_space<smem>>
    %5 = vector.broadcast %4 : f32 to vector<8x128xf32>
    %6 = arith.addf %3, %5 : vector<8x128xf32>
    %cst = arith.constant 0.000000e+00 : f32
    %7 = vector.broadcast %cst : f32 to vector<8x128xf32>
    %8 = arith.maximumf %6, %7 : vector<8x128xf32>
    %c0_3 = arith.constant 0 : index
    %c0_4 = arith.constant 0 : index
    %c0_5 = arith.constant 0 : index
    %9 = vector.load %arg4[%c0_3, %c0_4, %c0_5] : memref<3x8x128xf32, #tpu.memory_space<vmem>>, vector<1x8x128xf32>
    %10 = vector.shape_cast %9 : vector<1x8x128xf32> to vector<8x128xf32>
    %11 = vector.shape_cast %8 : vector<8x128xf32> to vector<1x8x128xf32>
    tpu.vector_store %arg4[%c0_3, %c0_4, %c0_5], %11 {strides = array<i32>} : memref<3x8x128xf32, #tpu.memory_space<vmem>>, vector<1x8x128xf32>,
    %c1 = arith.constant 1 : index
    %12 = memref.load %arg1[%c1] : memref<3xf32, #tpu.memory_space<smem>>
    %13 = vector.broadcast %12 : f32 to vector<8x128xf32>
    %14 = arith.mulf %0, %13 : vector<8x128xf32>
    %c1_6 = arith.constant 1 : index
    %15 = memref.load %arg2[%c1_6] : memref<3xf32, #tpu.memory_space<smem>>
    %16 = vector.broadcast %15 : f32 to vector<8x128xf32>
    %17 = arith.addf %14, %16 : vector<8x128xf32>
    %cst_7 = arith.constant 0.000000e+00 : f32
    %18 = vector.broadcast %cst_7 : f32 to vector<8x128xf32>
    %19 = arith.maximumf %17, %18 : vector<8x128xf32>
    %c1_8 = arith.constant 1 : index
    %c0_9 = arith.constant 0 : index
    %c0_10 = arith.constant 0 : index
    %20 = vector.load %arg4[%c1_8, %c0_9, %c0_10] : memref<3x8x128xf32, #tpu.memory_space<vmem>>, vector<1x8x128xf32>
    %21 = vector.shape_cast %20 : vector<1x8x128xf32> to vector<8x128xf32>
    %22 = vector.shape_cast %19 : vector<8x128xf32> to vector<1x8x128xf32>
    tpu.vector_store %arg4[%c1_8, %c0_9, %c0_10], %22 {strides = array<i32>} : memref<3x8x128xf32, #tpu.memory_space<vmem>>, vector<1x8x128xf32>,
    %c2 = arith.constant 2 : index
    %23 = memref.load %arg1[%c2] : memref<3xf32, #tpu.memory_space<smem>>
    %24 = vector.broadcast %23 : f32 to vector<8x128xf32>
    %25 = arith.mulf %0, %24 : vector<8x128xf32>
    %c2_11 = arith.constant 2 : index
    %26 = memref.load %arg2[%c2_11] : memref<3xf32, #tpu.memory_space<smem>>
    %27 = vector.broadcast %26 : f32 to vector<8x128xf32>
    %28 = arith.addf %25, %27 : vector<8x128xf32>
    %cst_12 = arith.constant 0.000000e+00 : f32
    %29 = vector.broadcast %cst_12 : f32 to vector<8x128xf32>
    %30 = arith.maximumf %28, %29 : vector<8x128xf32>
    %c2_13 = arith.constant 2 : index
    %c0_14 = arith.constant 0 : index
    %c0_15 = arith.constant 0 : index
    %31 = vector.load %arg4[%c2_13, %c0_14, %c0_15] : memref<3x8x128xf32, #tpu.memory_space<vmem>>, vector<1x8x128xf32>
    %32 = vector.shape_cast %31 : vector<1x8x128xf32> to vector<8x128xf32>
    %33 = vector.shape_cast %30 : vector<8x128xf32> to vector<1x8x128xf32>
    tpu.vector_store %arg4[%c2_13, %c0_14, %c0_15], %33 {strides = array<i32>} : memref<3x8x128xf32, #tpu.memory_space<vmem>>, vector<1x8x128xf32>,
    return
  }
  func.func @transform_0(%arg0: i32, %arg1: memref<3xf32, #tpu.memory_space<smem>>, %arg2: memref<3xf32, #tpu.memory_space<smem>>) -> (i32, i32) {
    %c0_i32 = arith.constant 0 : i32
    %c0_i32_0 = arith.constant 0 : i32
    return %arg0, %c0_i32 : i32, i32
  }
  func.func @transform_1(%arg0: i32, %arg1: memref<3xf32, #tpu.memory_space<smem>>, %arg2: memref<3xf32, #tpu.memory_space<smem>>) -> (i32, i32, i32) {
    %c0_i32 = arith.constant 0 : i32
    %c0_i32_0 = arith.constant 0 : i32
    %c0_i32_1 = arith.constant 0 : i32
    return %c0_i32, %arg0, %c0_i32_0 : i32, i32, i32
  }
}

</mosaic_0001>

<bundles_post_ra>
// kernel: net_forward.1
= control target key start
LH: loop header
LB: loop body
LE: loop exit
PB: predicated region body
PF: predicated region fallthrough
CT: control target
= control target key end

     0   :  { %s125_s0 = inlined_call_operand.vmem [shape: f32[3], index: 0, kind: input, shape index: {}]   ;;  %s126_s2 = inlined_call_operand.vmem [shape: f32[8,128], index: 2, kind: input, shape index: {}]   ;;  %s127_s3 = inlined_call_operand.vmem [shape: f32[3,8,128], index: 3, kind: output, shape index: {}]   ;;  %s128_s1 = inlined_call_operand.vmem [shape: f32[3], index: 1, kind: input, shape index: {}]  }
   0x1   :  { %s8_s14 = sshll.u32 %s125_s0, 4  ;;  %s12_s17 = sshll.u32 %s128_s1, 4  ;;  %s9_s14 = int_to_ptr.vmem [resolvable:$true] %s8_s14  ;;  %s13_s17 = int_to_ptr.vmem [resolvable:$true] %s12_s17 }
   0x2   :  { %s59_s18 = scalar_lea.vmem %s9_s14, 16  ;;  %p64_p1 = scmp.lt.s32.totalorder %s9_s14, %s9_s14 }
   0x3   :  { %p60_p0 = scmp.ne.s32.totalorder %s9_s14, %s59_s18  ;;  %p65_p2 = scmp.lt.s32.totalorder %s59_s18, %s59_s18 }
   0x5   :  { %p66_p3 = por %p65_p2, %p64_p1 }
   0x7   :  { %p67_p4 = pnand %p66_p3, %p60_p0 }
   0x9   :  { %70 = shalt.err (!%p67_p4)  }
   0xa   :  { %s85_s19 = smov [#allocation3]   ;;  %s71_s20 = scalar_lea.vmem %s13_s17, 16 }
   0xb   :  { %11 = dma.vmem_to_smem %s9_s14, 16, %s85_s19, [#allocation2] }
   0xc   :  { %p72_p5 = scmp.ne.s32.totalorder %s13_s17, %s71_s20  ;;  %p76_p6 = scmp.lt.s32.totalorder %s13_s17, %s13_s17 }
   0xd   :  { %p77_p7 = scmp.lt.s32.totalorder %s71_s20, %s71_s20 }
   0xf   :  { %p78_p8 = por %p77_p7, %p76_p6 }
  0x11   :  { %p79_p9 = pnand %p78_p8, %p72_p5 }
  0x13   :  { %82 = shalt.err (!%p79_p9)  }
  0x14   :  { %s86_s0 = smov [#allocation4]  }
  0x15   :  { %15 = dma.vmem_to_smem %s13_s17, 16, %s86_s0, [#allocation2] }
  0x16   :  { %83 = dma.done.wait [#allocation2], 32 }
  0x17   :  { %84 = vsyncadd [#allocation2], 4294967264 }
  0x18   :  { %17 = sfence }
  0x19   :  { %s21_s1 = sld [smem:[#allocation3]]  ;;  %v20_v0 = vld [vmem:[%s126_s2] sm:$0xff] }
  0x1a   :  { %s24_s21 = sld [smem:[#allocation4]] }
  0x1b   :  { %s51_s22 = sld [smem:[#allocation3 + $0x1]] }
  0x1c   :  { %s52_s23 = sld [smem:[#allocation4 + $0x1]] }
  0x1d   :  { %s54_s26 = sld [smem:[#allocation3 + $0x2]] }
  0x1e   :  { %s55_s27 = sld [smem:[#allocation4 + $0x2]] }
  0x1f   :  { %v22_v1 = vstv %s21_s1 }
  0x20   :  { %v23_v2 = vmul.f32 %v22_v1, %v20_v0  ;;  %v25_v3 = vstv %s24_s21 }
  0x21   :  { %v30_v4 = vstv %s51_s22 }
  0x22   :  { %v26_v5 = vadd.f32 %v25_v3, %v23_v2  ;;  %v31_v6 = vmul.f32 %v30_v4, %v20_v0  ;;  %v33_v7 = vstv %s52_s23 }
  0x23   :  { %v39_v8 = vstv %s54_s26 }
  0x24   :  { %v27_v9 = vmax.f32 %v26_v5, 0.0  ;;  %v34_v10 = vadd.f32 %v33_v7, %v31_v6  ;;  %v40_v11 = vmul.f32 %v39_v8, %v20_v0  ;;  %v42_v12 = vstv %s55_s27 }
  0x26   :  { %28 = vst [vmem:[%s127_s3] sm:$0xff] %v27_v9  ;;  %v35_v13 = vmax.f32 %v34_v10, 0.0  ;;  %v43_v14 = vadd.f32 %v42_v12, %v40_v11 }
  0x28   :  { %53 = vst [vmem:[%s127_s3 + $0x8] sm:$0xff] %v35_v13  ;;  %v44_v15 = vmax.f32 %v43_v14, 0.0 }
  0x2a   :  { %56 = vst [vmem:[%s127_s3 + $0x10] sm:$0xff] %v44_v15 }

</bundles_post_ra>
